<compile_context>
chip_gen: v6e
topology: v6e:2x2x1
jax: 0.10.0
libtpu: 0.0.40
codegen_flags: <defaults>
</compile_context>

<pallas_src>
import jax
import jax.numpy as jnp
from jax.experimental import pallas as pl
from jax.experimental.pallas import tpu as pltpu


# ----------------------------- Pallas kernel --------------------------------
def _gauss_attn_kernel(u_ref, r_ref, xw_ref, b_ref, o_ref):
    """Grid = (num_q_tiles, num_heads); heads accumulate into o_ref.

    u_ref : (H, 5)        per-head target vectors, SMEM (scalar reads)
    r_ref : (5, TQ, N)    positional feature planes for this query tile (f32)
    xw_ref: (1, N, B*C)   value-projected hidden states for this head (bf16)
    b_ref : (1, B*C)      value bias, tiled over the batch lanes (f32)
    o_ref : (TQ, B*C)     output tile, resident across the head axis (f32)
    """
    h = pl.program_id(1)

    # scores[q, k] = sum_d u[h, d] * R[d, q, k]  (SMEM scalar * plane, VPU)
    scores = (u_ref[h, 0] * r_ref[0]
              + u_ref[h, 1] * r_ref[1]
              + u_ref[h, 2] * r_ref[2]
              + u_ref[h, 3] * r_ref[3]
              + u_ref[h, 4] * r_ref[4])                      # (TQ, N) f32

    # f32 softmax (v5e-safe); normalization deferred past the matmul.
    m = jnp.max(scores, axis=-1, keepdims=True)
    e = jnp.exp(scores - m)
    inv_l = pl.reciprocal(jnp.sum(e, axis=-1, keepdims=True), approx=True)

    # (TQ, N) @ (N, B*C) on the MXU in bf16, f32 accumulation.
    vals = jnp.dot(e.astype(jnp.bfloat16), xw_ref[0],
                   preferred_element_type=jnp.float32)       # (TQ, B*C)
    contrib = vals * inv_l

    @pl.when(h == 0)
    def _():
        o_ref[...] = contrib + b_ref[...]

    @pl.when(h > 0)
    def _():
        o_ref[...] += contrib


# ------------------------------ glue helpers ---------------------------------
def relative_position_features(width, height):
    """R buffer of the module, flattened to (5, N, N) with N = width*height."""
    gi, gj = jnp.meshgrid(jnp.arange(width), jnp.arange(height), indexing='ij')
    grid = jnp.stack([gi, gj], axis=-1).astype(jnp.float32)          # (W, H, 2)
    rel = grid[None, None, :, :, :] - grid[:, :, None, None, :]      # (W,H,W,H,2)
    feats = jnp.concatenate(
        [rel, rel ** 2, (rel[..., 0] * rel[..., 1])[..., None]], axis=-1)
    n = width * height
    return jnp.transpose(feats.reshape(n, n, 5), (2, 0, 1)).astype(jnp.float32)


def heads_target_vectors(attention_centers, attention_spreads):
    """get_heads_target_vectors() for the non-isotropic gaussian case."""
    inv_cov = jnp.einsum('hij,hkj->hik', attention_spreads, attention_spreads)
    a = inv_cov[:, 0, 0]
    b = inv_cov[:, 0, 1]
    c = inv_cov[:, 1, 1]
    mu1 = attention_centers[:, 0]
    mu2 = attention_centers[:, 1]
    u = -0.5 * jnp.stack(
        [-2.0 * (a * mu1 + b * mu2), -2.0 * (c * mu2 + b * mu1), a, c, 2.0 * b],
        axis=-1)
    return u.astype(jnp.float32)                                      # (H, 5)


def _pick_tq(n):
    """Query-tile size: multiple of 8 that divides N (full N for small images)."""
    if n <= 512:
        return n
    for tq in (512, 256, 128, 64, 32, 16, 8):
        if n % tq == 0:
            return tq
    return n


# ------------------------------ JAX wrapper ----------------------------------
def gaussian_self_attention(hidden_states, attention_centers, attention_spreads,
                            value_weight, value_bias, r_planes=None, tq=None):
    """hidden_states: (B, W, H, C) float32.  Returns (B, W, H, C) float32."""
    B, W, Hs, C = hidden_states.shape
    num_heads = attention_centers.shape[0]
    N = W * Hs
    BC = B * C

    if r_planes is None:
        r_planes = relative_position_features(W, Hs)                 # (5, N, N)
    u = heads_target_vectors(attention_centers, attention_spreads)   # (H, 5)

    # Reordered value projection: out[b] = sum_h probs_h @ (x_b @ Wt_h) + bias.
    # xw[h] packs all batch elements along lanes -> (H, N, B*C), bf16 for MXU.
    x = hidden_states.reshape(B, N, C).astype(jnp.float32)
    wt_heads = value_weight.T.reshape(num_heads, C, C).astype(jnp.float32)
    xw = jnp.einsum('bnc,hcd->hnbd', x, wt_heads).reshape(
        num_heads, N, BC).astype(jnp.bfloat16)
    bias_tiled = jnp.tile(value_bias.astype(jnp.float32), (B,)).reshape(1, BC)

    if tq is None:
        tq = _pick_tq(N)
    grid = (N // tq, num_heads)

    out_flat = pl.pallas_call(
        _gauss_attn_kernel,
        out_shape=jax.ShapeDtypeStruct((N, BC), jnp.float32),
        grid=grid,
        in_specs=[
            pl.BlockSpec(memory_space=pltpu.MemorySpace.SMEM),        # u (H,5)
            pl.BlockSpec((5, tq, N), lambda q, h: (0, q, 0)),         # R planes
            pl.BlockSpec((1, N, BC), lambda q, h: (h, 0, 0)),         # xw (bf16)
            pl.BlockSpec((1, BC), lambda q, h: (0, 0)),               # bias
        ],
        out_specs=pl.BlockSpec((tq, BC), lambda q, h: (q, 0)),
        compiler_params=pltpu.CompilerParams(
            dimension_semantics=("parallel", "arbitrary")),
    )(u, r_planes, xw, bias_tiled)

    # (N, B*C) -> (B, W, H, C)
    out = out_flat.reshape(N, B, C).transpose(1, 0, 2)
    return out.reshape(B, W, Hs, C)


# pure-JAX reference of the original forward pass (f32, original op order)
def _reference(hidden_states, attention_centers, attention_spreads,
               value_weight, value_bias):
    B, W, Hs, C = hidden_states.shape
    num_heads = attention_centers.shape[0]
    N = W * Hs
    u = heads_target_vectors(attention_centers, attention_spreads)
    r = relative_position_features(W, Hs)                             # (5, N, N)
    scores = jnp.einsum('dqk,hd->qhk', r, u)                          # (N, H, N)
    probs = jax.nn.softmax(scores, axis=-1)
    x = hidden_states.reshape(B, N, C)
    vals = jnp.einsum('qhk,bkd->bqhd', probs, x).reshape(B, N, num_heads * C)
    out = vals @ value_weight.T + value_bias                          # (B, N, C)
    return out.reshape(B, W, Hs, C)


if __name__ == "__main__":
    # small shapes consistent with the module:
    #   batch=2, image 8x8 (N=64 tokens), hidden_size C=32, num_heads=4
    B, W, Hs, C = 2, 8, 8, 32
    num_heads = 4
    gaussian_init_mu_std = 2.0
    gaussian_init_sigma_std = 0.01

    key = jax.random.PRNGKey(0)
    k1, k2, k3, k4, k5 = jax.random.split(key, 5)

    hidden_states = jax.random.normal(k1, (B, W, Hs, C), jnp.float32)
    attention_centers = gaussian_init_mu_std * jax.random.normal(
        k2, (num_heads, 2), jnp.float32)
    attention_spreads = (jnp.eye(2, dtype=jnp.float32)[None]
                         + gaussian_init_sigma_std
                         * jax.random.normal(k3, (num_heads, 2, 2), jnp.float32))
    value_weight = 0.02 * jax.random.normal(k4, (C, num_heads * C), jnp.float32)
    value_bias = 0.02 * jax.random.normal(k5, (C,), jnp.float32)

    # registered-buffer equivalent: built once, reused across calls
    r_planes = relative_position_features(W, Hs)

    fwd = jax.jit(gaussian_self_attention)
    out = fwd(hidden_states, attention_centers, attention_spreads,
              value_weight, value_bias, r_planes)
    out = jax.block_until_ready(out)

    ref = _reference(hidden_states, attention_centers, attention_spreads,
                     value_weight, value_bias)
    assert out.shape == (B, W, Hs, C)
    max_err = float(jnp.max(jnp.abs(out - ref)))
    # bf16 MXU operands + approx reciprocal + reordered (equivalent) projection
    assert jnp.allclose(out, ref, atol=2e-2, rtol=2e-2), max_err

    print("KERNEL_OK")
</pallas_src>

<mosaic_0001>
module attributes {stable_mosaic.version = 11 : i64} {
  func.func @_gauss_attn_kernel(%arg0: i32, %arg1: i32, %arg2: memref<4x5xf32, #tpu.memory_space<smem>>, %arg3: memref<5x64x64xf32, #tpu.memory_space<vmem>>, %arg4: memref<1x64x64xbf16, #tpu.memory_space<vmem>>, %arg5: memref<1x64xf32, #tpu.memory_space<vmem>>, %arg6: memref<64x64xf32, #tpu.memory_space<vmem>>) attributes {dimension_semantics = [#tpu.dimension_semantics<parallel>, #tpu.dimension_semantics<arbitrary>], iteration_bounds = array<i64: 1, 4>, scalar_prefetch = 0 : i64, scratch_operands = 0 : i64, tpu.core_type = #tpu.core_type<tc>, window_params = [{transform_indices = @transform_0, window_bounds = array<i64: 4, 5>}, {transform_indices = @transform_1, window_bounds = array<i64: 5, 64, 64>}, {transform_indices = @transform_2, window_bounds = array<i64: 1, 64, 64>}, {pipeline_mode = #tpu.pipeline_mode<synchronous>, transform_indices = @transform_3, window_bounds = array<i64: 1, 64>}, {transform_indices = @transform_4, window_bounds = array<i64: 64, 64>}]} {
    %0 = arith.index_cast %arg1 : i32 to index
    %c0 = arith.constant 0 : index
    %1 = memref.load %arg2[%0, %c0] : memref<4x5xf32, #tpu.memory_space<smem>>
    %c0_0 = arith.constant 0 : index
    %c0_1 = arith.constant 0 : index
    %c0_2 = arith.constant 0 : index
    %2 = vector.load %arg3[%c0_0, %c0_1, %c0_2] : memref<5x64x64xf32, #tpu.memory_space<vmem>>, vector<1x64x64xf32>
    %3 = vector.shape_cast %2 : vector<1x64x64xf32> to vector<64x64xf32>
    %4 = vector.broadcast %1 : f32 to vector<64x64xf32>
    %5 = arith.mulf %4, %3 : vector<64x64xf32>
    %6 = arith.index_cast %arg1 : i32 to index
    %c1 = arith.constant 1 : index
    %7 = memref.load %arg2[%6, %c1] : memref<4x5xf32, #tpu.memory_space<smem>>
    %c1_3 = arith.constant 1 : index
    %c0_4 = arith.constant 0 : index
    %c0_5 = arith.constant 0 : index
    %8 = vector.load %arg3[%c1_3, %c0_4, %c0_5] : memref<5x64x64xf32, #tpu.memory_space<vmem>>, vector<1x64x64xf32>
    %9 = vector.shape_cast %8 : vector<1x64x64xf32> to vector<64x64xf32>
    %10 = vector.broadcast %7 : f32 to vector<64x64xf32>
    %11 = arith.mulf %10, %9 : vector<64x64xf32>
    %12 = arith.addf %5, %11 : vector<64x64xf32>
    %13 = arith.index_cast %arg1 : i32 to index
    %c2 = arith.constant 2 : index
    %14 = memref.load %arg2[%13, %c2] : memref<4x5xf32, #tpu.memory_space<smem>>
    %c2_6 = arith.constant 2 : index
    %c0_7 = arith.constant 0 : index
    %c0_8 = arith.constant 0 : index
    %15 = vector.load %arg3[%c2_6, %c0_7, %c0_8] : memref<5x64x64xf32, #tpu.memory_space<vmem>>, vector<1x64x64xf32>
    %16 = vector.shape_cast %15 : vector<1x64x64xf32> to vector<64x64xf32>
    %17 = vector.broadcast %14 : f32 to vector<64x64xf32>
    %18 = arith.mulf %17, %16 : vector<64x64xf32>
    %19 = arith.addf %12, %18 : vector<64x64xf32>
    %20 = arith.index_cast %arg1 : i32 to index
    %c3 = arith.constant 3 : index
    %21 = memref.load %arg2[%20, %c3] : memref<4x5xf32, #tpu.memory_space<smem>>
    %c3_9 = arith.constant 3 : index
    %c0_10 = arith.constant 0 : index
    %c0_11 = arith.constant 0 : index
    %22 = vector.load %arg3[%c3_9, %c0_10, %c0_11] : memref<5x64x64xf32, #tpu.memory_space<vmem>>, vector<1x64x64xf32>
    %23 = vector.shape_cast %22 : vector<1x64x64xf32> to vector<64x64xf32>
    %24 = vector.broadcast %21 : f32 to vector<64x64xf32>
    %25 = arith.mulf %24, %23 : vector<64x64xf32>
    %26 = arith.addf %19, %25 : vector<64x64xf32>
    %27 = arith.index_cast %arg1 : i32 to index
    %c4 = arith.constant 4 : index
    %28 = memref.load %arg2[%27, %c4] : memref<4x5xf32, #tpu.memory_space<smem>>
    %c4_12 = arith.constant 4 : index
    %c0_13 = arith.constant 0 : index
    %c0_14 = arith.constant 0 : index
    %29 = vector.load %arg3[%c4_12, %c0_13, %c0_14] : memref<5x64x64xf32, #tpu.memory_space<vmem>>, vector<1x64x64xf32>
    %30 = vector.shape_cast %29 : vector<1x64x64xf32> to vector<64x64xf32>
    %31 = vector.broadcast %28 : f32 to vector<64x64xf32>
    %32 = arith.mulf %31, %30 : vector<64x64xf32>
    %33 = arith.addf %26, %32 : vector<64x64xf32>
    %cst = arith.constant dense<0xFF800000> : vector<64xf32>
    %34 = vector.multi_reduction <maximumf>, %33, %cst [1] : vector<64x64xf32> to vector<64xf32>
    %35 = vector.shape_cast %34 : vector<64xf32> to vector<64x1xf32>
    %36 = vector.broadcast %35 : vector<64x1xf32> to vector<64x64xf32>
    %37 = arith.subf %33, %36 : vector<64x64xf32>
    %38 = math.exp %37 : vector<64x64xf32>
    %cst_15 = arith.constant dense<0.000000e+00> : vector<64xf32>
    %39 = vector.multi_reduction <add>, %38, %cst_15 [1] : vector<64x64xf32> to vector<64xf32>
    %40 = vector.shape_cast %39 : vector<64xf32> to vector<64x1xf32>
    %41 = tpu.reciprocal %40 {approx = true} : vector<64x1xf32> -> vector<64x1xf32>
    %42 = arith.truncf %38 : vector<64x64xf32> to vector<64x64xbf16>
    %c0_16 = arith.constant 0 : index
    %c0_17 = arith.constant 0 : index
    %c0_18 = arith.constant 0 : index
    %43 = vector.load %arg4[%c0_16, %c0_17, %c0_18] : memref<1x64x64xbf16, #tpu.memory_space<vmem>>, vector<1x64x64xbf16>
    %44 = vector.shape_cast %43 : vector<1x64x64xbf16> to vector<64x64xbf16>
    %cst_19 = arith.constant dense<0.000000e+00> : vector<64x64xf32>
    %45 = tpu.matmul %42, %44, %cst_19 {dimension_numbers = #tpu.dot_dimension_numbers<[1], [0], [0], [1], [0, 0, 1, 1], [], []>} : vector<64x64xbf16>, vector<64x64xbf16>, vector<64x64xf32> -> vector<64x64xf32>
    %46 = vector.broadcast %41 : vector<64x1xf32> to vector<64x64xf32>
    %47 = arith.mulf %45, %46 : vector<64x64xf32>
    %c0_i32 = arith.constant 0 : i32
    %48 = arith.cmpi eq, %arg1, %c0_i32 : i32
    %49 = arith.extui %48 : i1 to i32
    %c0_i32_20 = arith.constant 0 : i32
    %50 = arith.cmpi ne, %49, %c0_i32_20 : i32
    scf.if %50 {
      %c0_23 = arith.constant 0 : index
      %c0_24 = arith.constant 0 : index
      %54 = vector.load %arg5[%c0_23, %c0_24] : memref<1x64xf32, #tpu.memory_space<vmem>>, vector<1x64xf32>
      %55 = vector.broadcast %54 : vector<1x64xf32> to vector<64x64xf32>
      %56 = arith.addf %47, %55 : vector<64x64xf32>
      %c0_25 = arith.constant 0 : index
      %c0_26 = arith.constant 0 : index
      %57 = vector.load %arg6[%c0_25, %c0_26] : memref<64x64xf32, #tpu.memory_space<vmem>>, vector<64x64xf32>
      tpu.vector_store %arg6[%c0_25, %c0_26], %56 {strides = array<i32>} : memref<64x64xf32, #tpu.memory_space<vmem>>, vector<64x64xf32>,
    } else {
    }
    %c0_i32_21 = arith.constant 0 : i32
    %51 = arith.cmpi sgt, %arg1, %c0_i32_21 : i32
    %52 = arith.extui %51 : i1 to i32
    %c0_i32_22 = arith.constant 0 : i32
    %53 = arith.cmpi ne, %52, %c0_i32_22 : i32
    scf.if %53 {
      %c0_23 = arith.constant 0 : index
      %c0_24 = arith.constant 0 : index
      %54 = vector.load %arg6[%c0_23, %c0_24] : memref<64x64xf32, #tpu.memory_space<vmem>>, vector<64x64xf32>
      %55 = arith.addf %54, %47 : vector<64x64xf32>
      %c0_25 = arith.constant 0 : index
      %c0_26 = arith.constant 0 : index
      %56 = vector.load %arg6[%c0_25, %c0_26] : memref<64x64xf32, #tpu.memory_space<vmem>>, vector<64x64xf32>
      tpu.vector_store %arg6[%c0_25, %c0_26], %55 {strides = array<i32>} : memref<64x64xf32, #tpu.memory_space<vmem>>, vector<64x64xf32>,
    } else {
    }
    return
  }
  func.func @transform_0(%arg0: i32, %arg1: i32) -> (i32, i32) {
    %c0_i32 = arith.constant 0 : i32
    %c0_i32_0 = arith.constant 0 : i32
    %c0_i32_1 = arith.constant 0 : i32
    return %c0_i32, %c0_i32_0 : i32, i32
  }
  func.func @transform_1(%arg0: i32, %arg1: i32) -> (i32, i32, i32) {
    %c0_i32 = arith.constant 0 : i32
    %c0_i32_0 = arith.constant 0 : i32
    %c0_i32_1 = arith.constant 0 : i32
    return %c0_i32, %arg0, %c0_i32_0 : i32, i32, i32
  }
  func.func @transform_2(%arg0: i32, %arg1: i32) -> (i32, i32, i32) {
    %c0_i32 = arith.constant 0 : i32
    %c0_i32_0 = arith.constant 0 : i32
    %c0_i32_1 = arith.constant 0 : i32
    return %arg1, %c0_i32, %c0_i32_0 : i32, i32, i32
  }
  func.func @transform_3(%arg0: i32, %arg1: i32) -> (i32, i32) {
    %c0_i32 = arith.constant 0 : i32
    %c0_i32_0 = arith.constant 0 : i32
    %c0_i32_1 = arith.constant 0 : i32
    return %c0_i32, %c0_i32_0 : i32, i32
  }
  func.func @transform_4(%arg0: i32, %arg1: i32) -> (i32, i32) {
    %c0_i32 = arith.constant 0 : i32
    %c0_i32_0 = arith.constant 0 : i32
    return %arg0, %c0_i32 : i32, i32
  }
}

</mosaic_0001>

<bundles_post_ra>
// kernel: tile.8
= control target key start
LH: loop header
LB: loop body
LE: loop exit
PB: predicated region body
PF: predicated region fallthrough
CT: control target
= control target key end

     0   :  { %s22_s0 = inlined_call_operand.vmem [shape: f32[32], index: 0, kind: input, shape index: {}]   ;;  %s23_s1 = inlined_call_operand.vmem [shape: f32[2,32], index: 1, kind: output, shape index: {}]  }
   0x1   :  { %v4_v0 = vld [vmem:[%s22_s0] ss:$0 sm:$0xff] }
   0x2   :  { %5 = vst [vmem:[%s23_s1] sm:$0x3] %v4_v0 }

// kernel: tile.9
= control target key start
LH: loop header
LB: loop body
LE: loop exit
PB: predicated region body
PF: predicated region fallthrough
CT: control target
= control target key end

     0   :  { %vm8_vm0 = vcmask 261120   ;;  %vm14_vm1 = vcmask 523520   ;;  %s42_s0 = inlined_call_operand.vmem [shape: f32[2,32], index: 0, kind: input, shape index: {}]   ;;  %s43_s1 = inlined_call_operand.vmem [shape: f32[1,64], index: 1, kind: output, shape index: {}]  }
   0x1   :  { %v5_v0 = vld [vmem:[%s42_s0] sm:$0x3]  ;;  %s25_s0 = smov 32  }
   0x2   :  { %6 = vst [vmem:[#allocation1] sm:$0x3] %v5_v0 }
   0x9   :  { %v11_v1 = vld [vmem:[#allocation1 + $0x1] sm:$0x1]   ;;  %v7_v2 = vld [vmem:[#allocation1] sm:$0x1]  }
   0xa   :  { %12 = vrot.lane.b32.xlu0 %v11_v1, %s25_s0  ;;  %9 = vst.msk [vmem:[#allocation0] sm:$0x1] %vm8_vm0, %v7_v2  }
  0x7c   :  { %v13_v3 = vpop.permute.xlu0 %12  }
  0x7d   :  { %15 = vst.msk [vmem:[#allocation0] sm:$0x1] %vm14_vm1, %v13_v3  }
  0x84   :  { %v20_v4 = vld [vmem:[#allocation0] sm:$0x1] }
  0x85   :  { %23 = vst [vmem:[%s43_s1] sm:$0x1] %v20_v4 }

// kernel: gaussian_self_attention.1
= control target key start
LH: loop header
LB: loop body
LE: loop exit
PB: predicated region body
PF: predicated region fallthrough
CT: control target
= control target key end

     0   :  { %9 = vsyncpa [#allocation3], 0  ;;  %s955_s15 = smov 0   ;;  %s957_s16 = smov 0   ;;  %s1318_s0 = inlined_call_operand.vmem [shape: f32[4,5], index: 0, kind: input, shape index: {}]   ;;  %s1319_s1 = inlined_call_operand.vmem [shape: f32[5,64,64], index: 1, kind: input, shape index: {}]   ;;  %s1320_s2 = inlined_call_operand.vmem [shape: bf16[4,64,64], index: 2, kind: input, shape index: {}]   ;;  %s1321_s3 = inlined_call_operand.vmem [shape: f32[1,64], index: 3, kind: input, shape index: {}]   ;;  %s1322_s4 = inlined_call_operand.vmem [shape: f32[64,64], index: 4, kind: output, shape index: {}]  }
   0x1   :  { %s959_s17 = smov 0  }
   0x2 LB: > { %s725_s18 = sadd.s32 4294967295, %s927_s17   ;;  %s24_s19 = sadd.s32 1, %s923_s16  ;;  %s927_s17 = sphi %s959_s17, %s15_s17   ;;  %s923_s16 = sphi %s957_s16, %s1326_s16   ;;  %s919_s15 = sphi %s955_s15, %s1325_s15  }
   0x3   : > { %p25_p0 = scmp.ge.s32.totalorder %s24_s19, 4  ;;  %p726_p1 = scmp.ge.s32.totalorder %s927_s17, 1 }
   0x4   : > { %p152_p2 = scmp.lt.s32.totalorder %s927_s17, 5  ;;  %p980_p4 = scmp.eq.s32.totalorder %s725_s18, 0 }
   0x5   : > { %s1328_s19 = smov (%p25_p0, %s24_s19), 0  ;;  %s165_s24 = sshll.u32 %s1318_s0, 4  ;;  %s166_s24 = int_to_ptr.vmem [resolvable:$true] %s165_s24 }
   0x6   : > { %p976_p3 = pnand %p726_p1, %p152_p2  ;;  %s886_s25 = scalar_lea.vmem %s166_s24, 64 }
   0x7   : > { %p887_p7 = scmp.ne.s32.totalorder %s166_s24, %s886_s25  ;;  %p894_p11 = scmp.lt.s32.totalorder %s166_s24, %s166_s24 }
   0x8   : > { %p819_p5 = pneg %p976_p3  ;;  %p895_p12 = scmp.lt.s32.totalorder %s886_s25, %s886_s25 }
   0xa   : > { %p820_p6 = pnand %p980_p4, %p819_p5  ;;  %p896_p13 = por %p895_p12, %p894_p11 }
   0xc   : > { %p888_p8 = pneg %p820_p6 }
   0xe   : > { %p889_p9 = pnand %p888_p8, %p887_p7 }
  0x10   : > { %p890_p10 = pneg %p889_p9 }
  0x12   : > { %p897_p0 = pnand %p896_p13, %p890_p10 }
  0x14   : > { %900 = shalt.err (!%p897_p0)
}
  0x15   : > { %s929_s26 = smov [#allocation2]   ;;  %198 = sbr.rel (%p976_p3) target bundleno = 443 (0x1bb), region = 36 }
  0x16   : > { %822 = dma.vmem_to_smem (!%p820_p6), %s166_s24, 64, %s929_s26, [#allocation3]  }
  0x1a   : > { %914 = dma.done.wait (%p980_p4), [#allocation3], 64  }
  0x1b   : > { %916 = vsyncadd (%p980_p4), [#allocation3], 4294967232 }
  0x1c   : > { %204 = sfence }
  0x1d   : > { %s734_s27 = sshll.u32 %s919_s15, 7  ;;  %v254_v0 = vld [vmem:[%s1319_s1 + $0x20] sm:$0xff]  ;;  %v255_v2 = vld [vmem:[%s1319_s1 + $0x28] sm:$0xff]  ;;  %vm379_vm0 = vcmask 523264   ;;  %v253_v45 = vld [vmem:[%s1319_s1 + $0x18] sm:$0xff]  ;;  %p236_p1 = scmp.lt.s32.totalorder %s919_s15, 3 }
  0x1e   : > { %s249_s28 = sld [smem:[#allocation2 + %s734_s27]]  ;;  %s267_s29 = sadd.s32 1, %s734_s27  ;;  %v250_v1 = vld [vmem:[%s1319_s1] sm:$0xff]  ;;  %v740_v5 = vld [vmem:[%s1319_s1 + $0x68] sm:$0xff]  ;;  %v738_v46 = vld [vmem:[%s1319_s1 + $0x58] sm:$0xff] }
  0x1f   : > { %s268_s30 = sld [smem:[#allocation2 + %s267_s29]]  ;;  %s295_s5 = sadd.s32 2, %s734_s27  ;;  %v739_v3 = vld [vmem:[%s1319_s1 + $0x60] sm:$0xff]  ;;  %v748_v9 = vld [vmem:[%s1319_s1 + $0xa8] sm:$0xff]  ;;  %v746_v51 = vld [vmem:[%s1319_s1 + $0x98] sm:$0xff] }
  0x20   : > { %s296_s6 = sld [smem:[#allocation2 + %s295_s5]]  ;;  %s323_s7 = sadd.s32 3, %s734_s27  ;;  %v735_v4 = vld [vmem:[%s1319_s1 + $0x40] sm:$0xff]  ;;  %v756_v26 = vld [vmem:[%s1319_s1 + $0xe8] sm:$0xff]  ;;  %v754_v52 = vld [vmem:[%s1319_s1 + $0xd8] sm:$0xff] }
  0x21   : > { %s324_s8 = sld [smem:[#allocation2 + %s323_s7]]  ;;  %s351_s9 = sadd.s32 4, %s734_s27  ;;  %v747_v7 = vld [vmem:[%s1319_s1 + $0xa0] sm:$0xff]  ;;  %v764_v27 = vld [vmem:[%s1319_s1 + $0x128] sm:$0xff]  ;;  %v762_v57 = vld [vmem:[%s1319_s1 + $0x118] sm:$0xff] }
  0x22   : > { %s1001_s12 = sld [smem:[#allocation2 + %s351_s9]]  ;;  %v743_v8 = vld [vmem:[%s1319_s1 + $0x80] sm:$0xff]  ;;  %v251_v32 = vld [vmem:[%s1319_s1 + $0x8] sm:$0xff]  ;;  %v252_v62 = vld [vmem:[%s1319_s1 + $0x10] sm:$0xff]  ;;  %p775_p2 = scmp.ne.s32.totalorder %s919_s15, 0 }
  0x23   : > { %v755_v12 = vld [vmem:[%s1319_s1 + $0xe0] sm:$0xff]  ;;  %v736_v33 = vld [vmem:[%s1319_s1 + $0x48] sm:$0xff]  ;;  %v737_v63 = vld [vmem:[%s1319_s1 + $0x50] sm:$0xff] }
  0x24   : > { %v1018_v6 = vstv %s249_s28  ;;  %v763_v17 = vld [vmem:[%s1319_s1 + $0x120] sm:$0xff]  ;;  %v744_v34 = vld [vmem:[%s1319_s1 + $0x88] sm:$0xff] }
  0x25   : > { %v263_v10 = vmul.f32 %v1018_v6, %v254_v0  ;;  %v1030_v11 = vstv %s268_s30  ;;  %v259_v13 = vmul.f32 %v1018_v6, %v250_v1  ;;  %v264_v14 = vmul.f32 %v1018_v6, %v255_v2  ;;  %v751_v19 = vld [vmem:[%s1319_s1 + $0xc0] sm:$0xff]  ;;  %v752_v39 = vld [vmem:[%s1319_s1 + $0xc8] sm:$0xff] }
  0x26   : > { %v283_v15 = vmul.f32 %v739_v3, %v1030_v11  ;;  %v1038_v16 = vstv %s296_s6  ;;  %v279_v18 = vmul.f32 %v735_v4, %v1030_v11  ;;  %v759_v20 = vld [vmem:[%s1319_s1 + $0x100] sm:$0xff]  ;;  %v284_v21 = vmul.f32 %v740_v5, %v1030_v11  ;;  %v760_v40 = vld [vmem:[%s1319_s1 + $0x108] sm:$0xff]  ;;  %v745_v4 = vld [vmem:[%s1319_s1 + $0x90] sm:$0xff] }
  0x27   : > { %v311_v22 = vmul.f32 %v747_v7, %v1038_v16  ;;  %v1052_v23 = vstv %s324_s8  ;;  %v307_v24 = vmul.f32 %v743_v8, %v1038_v16  ;;  %v312_v25 = vmul.f32 %v748_v9, %v1038_v16 }
  0x28   : > { %v291_v28 = vadd.f32 %v283_v15, %v263_v10  ;;  %v339_v29 = vmul.f32 %v755_v12, %v1052_v23  ;;  %v1064_v30 = vstv %s1001_s12  ;;  %v287_v31 = vadd.f32 %v279_v18, %v259_v13  ;;  %v753_v10 = vld [vmem:[%s1319_s1 + $0xd0] sm:$0xff]  ;;  %v257_v12 = vld [vmem:[%s1319_s1 + $0x38] sm:$0xff]  ;;  %s237_s12 = scalar_select %p236_p1, %s919_s15, 3 }
  0x29   : > { %v367_v35 = vmul.f32 %v763_v17, %v1064_v30  ;;  %v335_v36 = vmul.f32 %v751_v19, %v1052_v23  ;;  %v363_v37 = vmul.f32 %v759_v20, %v1064_v30  ;;  %v292_v38 = vadd.f32 %v284_v21, %v264_v14  ;;  %v742_v18 = vld [vmem:[%s1319_s1 + $0x78] sm:$0xff] }
  0x2a   : > { %v319_v41 = vadd.f32 %v311_v22, %v291_v28  ;;  %v315_v42 = vadd.f32 %v307_v24, %v287_v31  ;;  %v340_v43 = vmul.f32 %v756_v26, %v1052_v23  ;;  %v368_v44 = vmul.f32 %v764_v27, %v1064_v30  ;;  %v750_v19 = vld [vmem:[%s1319_s1 + $0xb8] sm:$0xff]  ;;  %v761_v24 = vld [vmem:[%s1319_s1 + $0x110] sm:$0xff]  ;;  %s782_s7 = sshll.u32 %s237_s12, 5 }
  0x2b   : > { %v320_v47 = vadd.f32 %v312_v25, %v292_v38  ;;  %v260_v48 = vmul.f32 %v1018_v6, %v251_v32  ;;  %v280_v49 = vmul.f32 %v736_v33, %v1030_v11  ;;  %v308_v50 = vmul.f32 %v744_v34, %v1038_v16  ;;  %v758_v25 = vld [vmem:[%s1319_s1 + $0xf8] sm:$0xff]  ;;  %v256_v26 = vld [vmem:[%s1319_s1 + $0x30] sm:$0xff]  ;;  %s240_s11 = scalar_lea.vmem %s1320_s2, %s782_s7 }
  0x2c   : > { %v347_v53 = vadd.f32 %v339_v29, %v319_v41  ;;  %v343_v54 = vadd.f32 %v335_v36, %v315_v42  ;;  %v336_v55 = vmul.f32 %v752_v39, %v1052_v23  ;;  %v364_v56 = vmul.f32 %v760_v40, %v1064_v30  ;;  %v741_v32 = vld [vmem:[%s1319_s1 + $0x70] sm:$0xff] }
  0x2d   : > { %v348_v58 = vadd.f32 %v340_v43, %v320_v47  ;;  %v288_v59 = vadd.f32 %v280_v49, %v260_v48  ;;  %v262_v60 = vmul.f32 %v1018_v6, %v253_v45  ;;  %v282_v61 = vmul.f32 %v738_v46, %v1030_v11  ;;  %v749_v38 = vld [vmem:[%s1319_s1 + $0xb0] sm:$0xff] }
  0x2e   : > { %v1114_v0 = vadd.f32 %v367_v35, %v347_v53  ;;  %v1116_v1 = vadd.f32 %v363_v37, %v343_v54  ;;  %v310_v2 = vmul.f32 %v746_v51, %v1038_v16  ;;  %v338_v3 = vmul.f32 %v754_v52, %v1052_v23  ;;  %v766_v37 = vld [vmem:[%s1319_s1 + $0x138] sm:$0xff]  ;;  %v757_v43 = vld [vmem:[%s1319_s1 + $0xf0] sm:$0xff] }
  0x2f   : > { %v1123_v5 = vadd.f32 %v368_v44, %v348_v58  ;;  %v316_v7 = vadd.f32 %v308_v50, %v288_v59  ;;  %v290_v8 = vadd.f32 %v282_v61, %v262_v60  ;;  %v366_v9 = vmul.f32 %v762_v57, %v1064_v30 }
  0x30   : > { %v392_v13 = vsel %vm379_vm0, %v1114_v0, -inf  ;;  %v380_v14 = vsel %vm379_vm0, %v1116_v1, -inf  ;;  %v261_v15 = vmul.f32 %v1018_v6, %v252_v62  ;;  %v281_v17 = vmul.f32 %v737_v63, %v1030_v11  ;;  %v852_v63 = vld [vmem:[%s240_s11 + $0x8] sm:$0xff]  }
  0x31   : > { %393 = vmax.xlane.f32.xlu1 %v392_v13  ;;  %381 = vmax.xlane.f32.xlu0 %v380_v14  ;;  %v344_v20 = vadd.f32 %v336_v55, %v316_v7  ;;  %v318_v21 = vadd.f32 %v310_v2, %v290_v8  ;;  %v309_v22 = vmul.f32 %v745_v4, %v1038_v16  ;;  %v395_v27 = vsel %vm379_vm0, %v1123_v5, -inf  ;;  %v853_v2 = vld [vmem:[%s240_s11] sm:$0xff]  }
  0x32   : > { %v289_v28 = vadd.f32 %v281_v17, %v261_v15  ;;  %v337_v29 = vmul.f32 %v753_v10, %v1052_v23  ;;  %v266_v31 = vmul.f32 %v1018_v6, %v257_v12  ;;  %v286_v35 = vmul.f32 %v742_v18, %v1030_v11 }
  0x33   : > { %v1161_v33 = vadd.f32 %v364_v56, %v344_v20  ;;  %v346_v34 = vadd.f32 %v338_v3, %v318_v21  ;;  %v314_v36 = vmul.f32 %v750_v19, %v1038_v16  ;;  %v365_v40 = vmul.f32 %v761_v24, %v1064_v30 }
  0x34   : > { %v317_v39 = vadd.f32 %v309_v22, %v289_v28  ;;  %v342_v41 = vmul.f32 %v758_v25, %v1052_v23  ;;  %v265_v42 = vmul.f32 %v1018_v6, %v256_v26  ;;  %v294_v46 = vadd.f32 %v286_v35, %v266_v31  ;;  %v765_v6 = vld [vmem:[%s1319_s1 + $0x130] sm:$0xff] }
  0x35   : > { %396 = vmax.xlane.f32.xlu1 %v395_v27  ;;  %v383_v44 = vsel %vm379_vm0, %v1161_v33, -inf  ;;  %v1179_v45 = vadd.f32 %v366_v9, %v346_v34  ;;  %v285_v47 = vmul.f32 %v741_v32, %v1030_v11  ;;  %v370_v49 = vmul.f32 %v766_v37, %v1064_v30 }
  0x36   : > { %384 = vmax.xlane.f32.xlu0 %v383_v44  ;;  %v345_v48 = vadd.f32 %v337_v29, %v317_v39  ;;  %v313_v50 = vmul.f32 %v749_v38, %v1038_v16  ;;  %v322_v52 = vadd.f32 %v314_v36, %v294_v46  ;;  %v341_v54 = vmul.f32 %v757_v43, %v1052_v23  ;;  %v850_v23 = vld [vmem:[%s240_s11 + $0x18] sm:$0xff]  }
  0x37   : > { %v389_v51 = vsel %vm379_vm0, %v1179_v45, -inf  ;;  %v293_v53 = vadd.f32 %v285_v47, %v265_v42  ;;  %v369_v57 = vmul.f32 %v765_v6, %v1064_v30  ;;  %791 = vmatprep.subr.bf16.mxu0 %v850_v23  ;;  %807 = vmatprep.subr.bf16.mxu1 %v850_v23  ;;  %v851_v30 = vld [vmem:[%s240_s11 + $0x10] sm:$0xff]  }
  0x38   : > { %v373_v11 = vadd.f32 %v365_v40, %v345_v48  ;;  %v350_v55 = vadd.f32 %v342_v41, %v322_v52  ;;  %792 = vmatpush3.bf16.msra.mxu0 %v850_v23  ;;  %811 = vmatpush3.bf16.msra.mxu1 %v850_v23 }
  0x39   : > { %390 = vmax.xlane.f32.xlu1 %v389_v51  ;;  %v321_v56 = vadd.f32 %v313_v50, %v293_v53  ;;  %793 = vmatprep.subr.bf16.mxu0 %v851_v30 }
  0x3a   : > { %v386_v16 = vsel %vm379_vm0, %v373_v11, -inf  ;;  %v378_v58 = vadd.f32 %v370_v49, %v350_v55  ;;  %808 = vmatprep.subr.bf16.mxu1 %v851_v30 }
  0x3b   : > { %387 = vmax.xlane.f32.xlu0 %v386_v16  ;;  %v349_v59 = vadd.f32 %v341_v54, %v321_v56 }
  0x3c   : > { %v401_v60 = vsel %vm379_vm0, %v378_v58, -inf  ;;  %794 = vmatpush3.bf16.msra.mxu0 %v851_v30  ;;  %812 = vmatpush3.bf16.msra.mxu1 %v851_v30 }
  0x3d   : > { %v377_v61 = vadd.f32 %v369_v57, %v349_v59  ;;  %402 = vmax.xlane.f32.xlu1 %v401_v60  ;;  %795 = vmatprep.subr.bf16.mxu0 %v852_v63 }
  0x3e   : > { %809 = vmatprep.subr.bf16.mxu1 %v852_v63 }
  0x3f   : > { %v398_v62 = vsel %vm379_vm0, %v377_v61, -inf }
  0x40   : > { %399 = vmax.xlane.f32.xlu0 %v398_v62  ;;  %796 = vmatpush3.bf16.msra.mxu0 %v852_v63 }
  0x41   : > { %813 = vmatpush3.bf16.msra.mxu1 %v852_v63  ;;  %797 = vmatprep.subr.bf16.mxu0 %v853_v2 }
  0x42   : > { %810 = vmatprep.subr.bf16.mxu1 %v853_v2 }
  0x44   : > { %798 = vmatpush3.bf16.msra.mxu0 %v853_v2 }
  0x45   : > { %814 = vmatpush3.bf16.msra.mxu1 %v853_v2 }
  0xba   : > { %v394_v3 = vpop.xlane.xlu1 %393  ;;  %v382_v4 = vpop.xlane.xlu0 %381 }
  0xbb   : > { %v408_v7 = vsub.f32 %v1114_v0, %v394_v3  ;;  %v404_v8 = vsub.f32 %v1116_v1, %v382_v4 }
  0xbd   : > { %v412_v9 = vmul.f32 1.442695, %v404_v8  ;;  %v420_v10 = vmul.f32 1.442695, %v408_v7 }
  0xbe   : > { %v397_v12 = vpop.xlane.xlu1 %396 }
  0xbf   : > { %v409_v13 = vsub.f32 %v1123_v5, %v397_v12  ;;  %v385_v14 = vpop.xlane.xlu0 %384  ;;  %854 = vpow2.f32 %v412_v9 }
  0xc0   : > { %v405_v15 = vsub.f32 %v1161_v33, %v385_v14  ;;  %856 = vpow2.f32 %v420_v10 }
  0xc1   : > { %v422_v17 = vmul.f32 1.442695, %v409_v13 }
  0xc2   : > { %v414_v18 = vmul.f32 1.442695, %v405_v15  ;;  %v391_v19 = vpop.xlane.xlu1 %390 }
  0xc3   : > { %858 = vpow2.f32 %v422_v17  ;;  %v407_v20 = vsub.f32 %v1179_v45, %v391_v19 }
  0xc4   : > { %860 = vpow2.f32 %v414_v18  ;;  %v388_v0 = vpop.xlane.xlu0 %387 }
  0xc5   : > { %v418_v21 = vmul.f32 1.442695, %v407_v20  ;;  %v406_v1 = vsub.f32 %v373_v11, %v388_v0 }
  0xc6   : > { %v403_v24 = vpop.xlane.xlu1 %402 }
  0xc7   : > { %862 = vpow2.f32 %v418_v21  ;;  %v416_v22 = vmul.f32 1.442695, %v406_v1  ;;  %v411_v25 = vsub.f32 %v378_v58, %v403_v24 }
  0xc9   : > { %864 = vpow2.f32 %v416_v22  ;;  %v400_v5 = vpop.xlane.xlu0 %399  ;;  %v426_v26 = vmul.f32 1.442695, %v411_v25 }
  0xca   : > { %v410_v27 = vsub.f32 %v377_v61, %v400_v5 }
  0xcb   : > { %866 = vpow2.f32 %v426_v26 }
  0xcc   : > { %v424_v28 = vmul.f32 1.442695, %v410_v27  ;;  %v855_v29 = vpop.eup %854 }
  0xcd   : > { %v428_v31 = vsel %vm379_vm0, %v855_v29, 0.0  ;;  %v857_v32 = vpop.eup %856 }
  0xce   : > { %868 = vpow2.f32 %v424_v28  ;;  %429 = vadd.xlane.f32.xlu0 %v428_v31  ;;  %v440_v46 = vsel %vm379_vm0, %v857_v32, 0.0 }
  0xd0   : > { %v859_v33 = vpop.eup %858 }
  0xd1   : > { %v861_v34 = vpop.eup %860  ;;  %v462_v35 = vpack.c.bf16 %v859_v33, %v857_v32  ;;  %v443_v44 = vsel %vm379_vm0, %v859_v33, 0.0 }
  0xd2   : > { %v431_v36 = vsel %vm379_vm0, %v861_v34, 0.0  ;;  %v460_v37 = vpack.c.bf16 %v861_v34, %v855_v29 }
  0xd3   : > { %432 = vadd.xlane.f32.xlu1 %v431_v36  ;;  %803 = vmatprep.mubr.msk.bf16.mxu1 %vm379_vm0, %v462_v35 }
  0xd4   : > { %v863_v38 = vpop.eup %862  ;;  %799 = vmatprep.mubr.msk.bf16.mxu0 %vm379_vm0, %v460_v37 }
  0xd5   : > { %v437_v39 = vsel %vm379_vm0, %v863_v38, 0.0 }
  0xd6   : > { %v865_v40 = vpop.eup %864 }
  0xd7   : > { %438 = vadd.xlane.f32.xlu1 %v437_v39  ;;  %v434_v41 = vsel %vm379_vm0, %v865_v40, 0.0  ;;  %v461_v42 = vpack.c.bf16 %v863_v38, %v865_v40 }
  0xd8   : > { %435 = vadd.xlane.f32.xlu0 %v434_v41  ;;  %v867_v43 = vpop.eup %866 }
  0xd9   : > { %800 = vmatmul.mubr.msk.bf16.vlgmr.msra.gmra.mxu0 %vm379_vm0, %v461_v42  ;;  %v449_v48 = vsel %vm379_vm0, %v867_v43, 0.0 }
  0xdb   : > { %v869_v45 = vpop.eup %868  ;;  %444 = vadd.xlane.f32.xlu1 %v443_v44 }
  0xdc   : > { %441 = vadd.xlane.f32.xlu0 %v440_v46  ;;  %v463_v47 = vpack.c.bf16 %v867_v43, %v869_v45  ;;  %v446_v49 = vsel %vm379_vm0, %v869_v45, 0.0 }
  0xde   : > { %804 = vmatmul.mubr.msk.bf16.vlgmr.msra.gmra.mxu1 %vm379_vm0, %v463_v47 }
  0xdf   : > { %450 = vadd.xlane.f32.xlu1 %v449_v48 }
  0xe0   : > { %447 = vadd.xlane.f32.xlu0 %v446_v49 }
 0x157   : > { %v430_v50 = vpop.xlane.xlu0 %429 }
 0x15c   : > { %v433_v6 = vpop.xlane.xlu1 %432 }
 0x160   : > { %v439_v52 = vpop.xlane.xlu1 %438 }
 0x161   : > { %v436_v51 = vpop.xlane.xlu0 %435 }
 0x162   : > { %870 = vrcp.f32 %v436_v51 }
 0x163   : > { %872 = vrcp.f32 %v430_v50 }
 0x164   : > { %v445_v54 = vpop.xlane.xlu1 %444  ;;  %874 = vrcp.f32 %v439_v52 }
 0x165   : > { %v442_v53 = vpop.xlane.xlu0 %441 }
 0x168   : > { %v451_v55 = vpop.xlane.xlu1 %450 }
 0x169   : > { %v448_v11 = vpop.xlane.xlu0 %447 }
 0x16a   : > { %876 = vrcp.f32 %v448_v11 }
 0x16b   : > { %878 = vrcp.f32 %v433_v6 }
 0x16c   : > { %880 = vrcp.f32 %v442_v53 }
 0x16d   : > { %882 = vrcp.f32 %v451_v55 }
 0x16e   : > { %884 = vrcp.f32 %v445_v54 }
 0x16f   : > { %v871_v56 = vpop.eup %870 }
 0x170   : > { %v873_v58 = vpop.eup %872 }
 0x171   : > { %v875_v61 = vpop.eup %874 }
 0x177   : > { %v877_v23 = vpop.eup %876 }
 0x178   : > { %v879_v2 = vpop.eup %878 }
 0x179   : > { %v881_v7 = vpop.eup %880 }
 0x17a   : > { %v883_v12 = vpop.eup %882 }
 0x17b   : > { %v885_v15 = vpop.eup %884 }
 0x199   : > { %v801_v57 = vpop.f32.mrf.mxu0 }
 0x19a   : > { %v575_v16 = vmul.f32 %v871_v56, %v801_v57 }
 0x19b   : > { %v542_v59 = vpop.f32.mrf.mxu0 }
 0x19c   : > { %v573_v60 = vmul.f32 %v873_v58, %v542_v59 }
 0x19d   : > { %v802_v62 = vpop.f32.mrf.mxu0 }
 0x19e   : > { %v576_v30 = vmul.f32 %v875_v61, %v802_v62  ;;  %v805_v63 = vpop.f32.mrf.mxu1 }
 0x19f   : > { %v579_v3 = vmul.f32 %v877_v23, %v805_v63  ;;  %v545_v4 = vpop.f32.mrf.mxu0 }
 0x1a0   : > { %v574_v8 = vmul.f32 %v879_v2, %v545_v4  ;;  %v558_v9 = vpop.f32.mrf.mxu1 }
 0x1a1   : > { %v577_v10 = vmul.f32 %v881_v7, %v558_v9  ;;  %584 = sbr.rel (%p775_p2) target bundleno = 429 (0x1ad), region = 44 }
 0x1a2   : > { %v806_v13 = vpop.f32.mrf.mxu1 }
 0x1a3   : > { %v580_v14 = vmul.f32 %v883_v12, %v806_v13 }
 0x1a4   : > { %v561_v17 = vpop.f32.mrf.mxu1 }
 0x1a5   : > { %v578_v18 = vmul.f32 %v885_v15, %v561_v17 }
 0x1a6   : > { %v776_v19 = vld [vmem:[%s1321_s3] ss:$0 sm:$0xff] }
 0x1a7   : > { %v592_v20 = vadd.f32 %v776_v19, %v573_v60  ;;  %v593_v0 = vadd.f32 %v776_v19, %v574_v8  ;;  %v594_v21 = vadd.f32 %v776_v19, %v575_v16  ;;  %v595_v1 = vadd.f32 %v776_v19, %v576_v30 }
 0x1a8   : > { %v596_v22 = vadd.f32 %v776_v19, %v577_v10  ;;  %v597_v24 = vadd.f32 %v776_v19, %v578_v18  ;;  %v598_v25 = vadd.f32 %v776_v19, %v579_v3  ;;  %v599_v5 = vadd.f32 %v776_v19, %v580_v14 }
 0x1a9   : > { %600 = vst.msk [vmem:[%s1322_s4] sm:$0xff] %vm379_vm0, %v592_v20  ;;  %601 = vst.msk [vmem:[%s1322_s4 + $0x8] sm:$0xff] %vm379_vm0, %v593_v0 }
 0x1aa   : > { %602 = vst.msk [vmem:[%s1322_s4 + $0x10] sm:$0xff] %vm379_vm0, %v594_v21  ;;  %603 = vst.msk [vmem:[%s1322_s4 + $0x18] sm:$0xff] %vm379_vm0, %v595_v1 }
 0x1ab   : > { %604 = vst.msk [vmem:[%s1322_s4 + $0x20] sm:$0xff] %vm379_vm0, %v596_v22  ;;  %605 = vst.msk [vmem:[%s1322_s4 + $0x28] sm:$0xff] %vm379_vm0, %v597_v24 }
 0x1ac   : > { %606 = vst.msk [vmem:[%s1322_s4 + $0x30] sm:$0xff] %vm379_vm0, %v598_v25  ;;  %607 = vst.msk [vmem:[%s1322_s4 + $0x38] sm:$0xff] %vm379_vm0, %v599_v5 }
 0x1ad PF: > { %p777_p3 = scmp.le.s32.totalorder %s919_s15, 0 }
 0x1af   : > { %611 = sbr.rel (%p777_p3) target bundleno = 443 (0x1bb), region = 48 }
 0x1b4   : > { %v612_v26 = vld [vmem:[%s1322_s4] sm:$0xff]  ;;  %v613_v27 = vld [vmem:[%s1322_s4 + $0x8] sm:$0xff]  ;;  %v614_v28 = vld [vmem:[%s1322_s4 + $0x10] sm:$0xff] }
 0x1b5   : > { %v620_v29 = vadd.f32 %v612_v26, %v573_v60  ;;  %v621_v31 = vadd.f32 %v613_v27, %v574_v8  ;;  %v622_v32 = vadd.f32 %v614_v28, %v575_v16  ;;  %v615_v33 = vld [vmem:[%s1322_s4 + $0x18] sm:$0xff]  ;;  %v616_v34 = vld [vmem:[%s1322_s4 + $0x20] sm:$0xff]  ;;  %v617_v35 = vld [vmem:[%s1322_s4 + $0x28] sm:$0xff] }
 0x1b6   : > { %v623_v36 = vadd.f32 %v615_v33, %v576_v30  ;;  %v624_v37 = vadd.f32 %v616_v34, %v577_v10  ;;  %v625_v38 = vadd.f32 %v617_v35, %v578_v18  ;;  %v618_v39 = vld [vmem:[%s1322_s4 + $0x30] sm:$0xff]  ;;  %v619_v40 = vld [vmem:[%s1322_s4 + $0x38] sm:$0xff] }
 0x1b7   : > { %628 = vst.msk [vmem:[%s1322_s4] sm:$0xff] %vm379_vm0, %v620_v29  ;;  %629 = vst.msk [vmem:[%s1322_s4 + $0x8] sm:$0xff] %vm379_vm0, %v621_v31  ;;  %v626_v41 = vadd.f32 %v618_v39, %v579_v3  ;;  %v627_v42 = vadd.f32 %v619_v40, %v580_v14 }
 0x1b8   : > { %630 = vst.msk [vmem:[%s1322_s4 + $0x10] sm:$0xff] %vm379_vm0, %v622_v32  ;;  %631 = vst.msk [vmem:[%s1322_s4 + $0x18] sm:$0xff] %vm379_vm0, %v623_v36 }
 0x1b9   : > { %632 = vst.msk [vmem:[%s1322_s4 + $0x20] sm:$0xff] %vm379_vm0, %v624_v37  ;;  %633 = vst.msk [vmem:[%s1322_s4 + $0x28] sm:$0xff] %vm379_vm0, %v625_v38 }
 0x1ba   : > { %634 = vst.msk [vmem:[%s1322_s4 + $0x30] sm:$0xff] %vm379_vm0, %v626_v41  ;;  %635 = vst.msk [vmem:[%s1322_s4 + $0x38] sm:$0xff] %vm379_vm0, %v627_v42 }
 0x1bb PF: > { %s15_s17 = sadd.s32 1, %s927_s17   ;;  %s1325_s15 = smov %s923_s16 }
 0x1bc   : > { %p12_p4 = scmp.ge.s32.totalorder %s15_s17, 6   ;;  %s1326_s16 = smov %s1328_s19 }
 0x1be   :  { %14 = sbr.rel (!%p12_p4) target bundleno = 2 (0x2), region = 86 }
 0x1c3   :  { %658 = vsyncpa [#allocation3], 1 }
 0x1c4   :  { %660 = vsyncpa [#allocation3 + $0x1], 1 }

</bundles_post_ra>
